<compile_context>
chip_gen: v7x
topology: tpu7x:2x2x1
jax: 0.10.0
libtpu: 0.0.40
codegen_flags: <defaults>
</compile_context>

<pallas_src>
import math
import functools

import jax
import jax.numpy as jnp
import numpy as np
from jax.experimental import pallas as pl
from jax.experimental.pallas import tpu as pltpu

# ----------------------------- configuration -----------------------------
D_MODEL = 32
N_HEADS = 4
D_KV = 8
INNER = N_HEADS * D_KV          # 32
QKV_FUSED = 3 * INNER           # 96
D_FF = 128                      # T5LayerFF hidden dim (lane-dense)
NUM_BUCKETS = 32
LN_EPS = 1e-6
IS_DECODER = False

# ---- packed weight-slab layout (one lane-dense (SLAB_ROWS, 128) HBM array) --
SLAB_COLS = 128                 # full vreg lane width
ROW_WQKV = 0                    # (D_MODEL, 128)  fused [Wq|Wk|Wv|pad]
ROW_WI = ROW_WQKV + D_MODEL     # (D_MODEL, 128)  FF wi
ROW_WFFO = ROW_WI + D_MODEL     # (D_FF, D_MODEL) FF wo   (cols 0:D_MODEL)
ROW_WO = ROW_WFFO + D_FF        # (INNER, D_MODEL) attn Wo (cols 0:D_MODEL)
ROW_LN1 = ROW_WO + INNER        # row ROW_LN1, cols 0:D_MODEL (8-row padded)
ROW_LN2 = ROW_LN1 + 8           # row ROW_LN2, cols 0:D_MODEL (8-row padded)
SLAB_ROWS = ROW_LN2 + 8         # 240


# ------------------- relative position bias (plain JAX glue) -------------
def _relative_position_bucket(relative_position, bidirectional=True,
                              num_buckets=32, max_distance=128):
    ret = jnp.zeros_like(relative_position)
    n = -relative_position
    if bidirectional:
        num_buckets //= 2
        ret = ret + (n < 0).astype(jnp.int32) * num_buckets
        n = jnp.abs(n)
    else:
        n = jnp.maximum(n, 0)
    max_exact = num_buckets // 2
    is_small = n < max_exact
    n_safe = jnp.maximum(n, 1).astype(jnp.float32)
    val_if_large = max_exact + (
        jnp.log(n_safe / max_exact) / math.log(max_distance / max_exact)
        * (num_buckets - max_exact)
    ).astype(jnp.int32)
    val_if_large = jnp.minimum(val_if_large, num_buckets - 1)
    ret = ret + jnp.where(is_small, n, val_if_large)
    return ret


def compute_position_bias(rel_attn_bias_table, qlen, klen, is_decoder=False):
    """Returns [1, H, qlen, klen] position bias (T5 `compute_bias`)."""
    context_position = jnp.arange(qlen, dtype=jnp.int32)[:, None]
    memory_position = jnp.arange(klen, dtype=jnp.int32)[None, :]
    relative_position = memory_position - context_position
    rp_bucket = _relative_position_bucket(
        relative_position, bidirectional=not is_decoder,
        num_buckets=NUM_BUCKETS)
    values = rel_attn_bias_table[rp_bucket]          # [q, k, H]
    values = jnp.transpose(values, (2, 0, 1))[None]  # [1, H, q, k]
    return values


# --------------------- load-time parameter packing ------------------------
def pack_weight_slab(params):
    """One-time (load-time) packing of every weight into a single lane-dense
    (SLAB_ROWS, 128) slab so the kernel needs exactly one weight DMA."""
    def pad_cols(a):
        return jnp.pad(a, ((0, 0), (0, SLAB_COLS - a.shape[1])))

    wqkv = jnp.concatenate(
        [params["wq"], params["wk"], params["wv"],
         jnp.zeros((D_MODEL, SLAB_COLS - QKV_FUSED), jnp.float32)],
        axis=1)                                                  # (D, 128)
    wi = params["wi"]                                            # (D, 128)
    wffo = pad_cols(params["wff_o"])                             # (D_FF, 128)
    wo = pad_cols(params["wo"])                                  # (INNER, 128)
    ln1 = jnp.pad(pad_cols(params["ln1_w"]), ((0, 7), (0, 0)))   # (8, 128)
    ln2 = jnp.pad(pad_cols(params["ln2_w"]), ((0, 7), (0, 0)))   # (8, 128)
    slab = jnp.concatenate([wqkv, wi, wffo, wo, ln1, ln2], axis=0)
    assert slab.shape == (SLAB_ROWS, SLAB_COLS)
    return slab


# ------------------------------ Pallas kernel -----------------------------
def _amr_t5_block_kernel(x_ref, pb_ref, w_ref, out_ref, *,
                         n_heads, d_kv, d_model, d_ff, eps):
    inner = n_heads * d_kv
    x = x_ref[...]                                          # (S, D)

    # static slices into the single packed weight slab (zero-cost ref views /
    # cheap masked lane loads — all row offsets are multiples of 8).
    wqkv = w_ref[ROW_WQKV:ROW_WQKV + d_model, :]            # (D, 128)
    wi = w_ref[ROW_WI:ROW_WI + d_model, :]                  # (D, 128)
    wffo = w_ref[ROW_WFFO:ROW_WFFO + d_ff, 0:d_model]       # (D_FF, D)
    wo = w_ref[ROW_WO:ROW_WO + inner, 0:d_model]            # (INNER, D)
    ln1 = w_ref[ROW_LN1:ROW_LN1 + 1, 0:d_model]             # (1, D)
    ln2 = w_ref[ROW_LN2:ROW_LN2 + 1, 0:d_model]             # (1, D)

    # --- T5LayerNorm #1 (RMS norm, no mean subtraction) ---
    var = jnp.mean(x * x, axis=-1, keepdims=True)
    nx = x * jax.lax.rsqrt(var + eps) * ln1

    # --- fused q/k/v projection: ONE lane-dense (D, 128) matmul ---
    qkv = jnp.dot(nx, wqkv, preferred_element_type=jnp.float32)   # (S, 128)

    # --- per-head attention straight from the in-register lane slices of qkv
    #     (no VMEM scratch round-trip).  T5 uses NO 1/sqrt(d_kv) scaling. ---
    # TODO(synk): at scale, pack heads block-diagonally into one K=inner MXU
    # contraction and flash-tile the key axis instead of per-head (S,S) scores.
    ctx_parts = []
    for h in range(n_heads):
        lo = h * d_kv
        qh = qkv[:, lo:lo + d_kv]
        kh = qkv[:, inner + lo:inner + lo + d_kv]
        vh = qkv[:, 2 * inner + lo:2 * inner + lo + d_kv]
        s = jax.lax.dot_general(qh, kh, (((1,), (1,)), ((), ())),
                                preferred_element_type=jnp.float32)  # (S, S)
        s = s + pb_ref[h]                                            # + bias
        s = s - jnp.max(s, axis=-1, keepdims=True)
        e = jnp.exp(s)
        p = e * pl.reciprocal(jnp.sum(e, axis=-1, keepdims=True), approx=True)
        ctx_parts.append(jnp.dot(p, vh, preferred_element_type=jnp.float32))

    # --- re-pack heads along lanes, then ONE (S, inner) @ (inner, D) output
    #     projection (no sequential per-head accumulate chain). ---
    ctx = jnp.concatenate(ctx_parts, axis=-1)               # (S, inner)
    h1 = x + jnp.dot(ctx, wo, preferred_element_type=jnp.float32)   # residual 1

    # --- T5LayerFF: RMS norm -> wi -> relu -> wo -> residual ---
    var2 = jnp.mean(h1 * h1, axis=-1, keepdims=True)
    n2 = h1 * jax.lax.rsqrt(var2 + eps) * ln2
    mid = jnp.maximum(
        jnp.dot(n2, wi, preferred_element_type=jnp.float32), 0.0)   # (S, 128)
    ff = jnp.dot(mid, wffo, preferred_element_type=jnp.float32)     # (S, D)

    # Output is (S, D) = (8, 32): 1 KiB per step — masked vst is noise here.
    # TODO(synk): present a lane-dense (.., 128) output slab if D or the
    # per-step token count grows.
    out_ref[...] = h1 + ff


# --------------------------------- wrapper ---------------------------------
@jax.jit
def amr_t5_block_forward(hidden_states, w_slab, rel_bias):
    """hidden_states: [B, S, D] float32; w_slab: packed (SLAB_ROWS, 128) weights.
    Returns (layer_output [B,S,D], position_bias [1,H,S,S])."""
    B, S, D = hidden_states.shape

    # position bias (T5 compute_bias) — tiny integer bucketing + gather glue.
    pos_bias = compute_position_bias(rel_bias, S, S, IS_DECODER)    # (1,H,S,S)
    pb = pos_bias[0].astype(jnp.float32)                            # (H,S,S)

    x2d = hidden_states.reshape(B * S, D)

    kernel = functools.partial(_amr_t5_block_kernel,
                               n_heads=N_HEADS, d_kv=D_KV, d_model=D_MODEL,
                               d_ff=D_FF, eps=LN_EPS)

    out2d = pl.pallas_call(
        kernel,
        out_shape=jax.ShapeDtypeStruct((B * S, D), jnp.float32),
        grid=(B,),                                   # one sequence per step
        in_specs=[
            pl.BlockSpec((S, D), lambda b: (b, 0)),              # this batch's tokens
            pl.BlockSpec((N_HEADS, S, S), lambda b: (0, 0, 0)),  # shared position bias
            pl.BlockSpec((SLAB_ROWS, SLAB_COLS), lambda b: (0, 0)),  # packed weights (1 DMA)
        ],
        out_specs=pl.BlockSpec((S, D), lambda b: (b, 0)),
        compiler_params=pltpu.CompilerParams(
            # batch steps are independent: shard across TensorCores on v7x.
            dimension_semantics=("parallel",)),
    )(x2d, pb, w_slab)

    return out2d.reshape(B, S, D), pos_bias


# --------------------------- pure-JAX reference ---------------------------
def reference_forward(hidden_states, params):
    x = hidden_states
    B, S, _ = x.shape
    # --- self-attention sub-layer ---
    var = jnp.mean(x * x, axis=-1, keepdims=True)
    nx = x * jax.lax.rsqrt(var + LN_EPS) * params["ln1_w"]
    q = nx @ params["wq"]
    k = nx @ params["wk"]
    v = nx @ params["wv"]

    def split(t):  # [B,S,inner] -> [B,H,S,dk]
        return t.reshape(B, S, N_HEADS, D_KV).transpose(0, 2, 1, 3)

    q, k, v = split(q), split(k), split(v)
    scores = jnp.einsum("bhqd,bhkd->bhqk", q, k)
    scores = scores + compute_position_bias(params["rel_bias"], S, S, IS_DECODER)
    weights = jax.nn.softmax(scores.astype(jnp.float32), axis=-1)
    ctx = jnp.einsum("bhqk,bhkd->bhqd", weights, v)
    ctx = ctx.transpose(0, 2, 1, 3).reshape(B, S, INNER)
    h1 = x + ctx @ params["wo"]
    # --- feed-forward sub-layer (T5LayerFF, relu, eval mode) ---
    var2 = jnp.mean(h1 * h1, axis=-1, keepdims=True)
    n2 = h1 * jax.lax.rsqrt(var2 + LN_EPS) * params["ln2_w"]
    ff = jnp.maximum(n2 @ params["wi"], 0.0) @ params["wff_o"]
    return h1 + ff


# ---------------------------------- main ----------------------------------
if __name__ == "__main__":
    B, S = 2, 8
    key = jax.random.PRNGKey(0)
    (k_x, k_q, k_k, k_v, k_o, k_rb,
     k_wi, k_wo2, k_l1, k_l2) = jax.random.split(key, 10)

    params = {
        # nn.Linear stores [out, in]; we store the transposed [in, out] form.
        "wq": jax.random.normal(k_q, (D_MODEL, INNER), jnp.float32) * 0.05,
        "wk": jax.random.normal(k_k, (D_MODEL, INNER), jnp.float32) * 0.05,
        "wv": jax.random.normal(k_v, (D_MODEL, INNER), jnp.float32) * 0.05,
        "wo": jax.random.normal(k_o, (INNER, D_MODEL), jnp.float32) * 0.05,
        "wi": jax.random.normal(k_wi, (D_MODEL, D_FF), jnp.float32) * 0.05,
        "wff_o": jax.random.normal(k_wo2, (D_FF, D_MODEL), jnp.float32) * 0.05,
        # ln weights ~ 1 but randomized so the multiply path is actually tested
        "ln1_w": 1.0 + 0.1 * jax.random.normal(k_l1, (1, D_MODEL), jnp.float32),
        "ln2_w": 1.0 + 0.1 * jax.random.normal(k_l2, (1, D_MODEL), jnp.float32),
        "rel_bias": jax.random.normal(k_rb, (NUM_BUCKETS, N_HEADS),
                                      jnp.float32) * 0.1,
    }

    hidden_states = jax.random.normal(k_x, (B, S, D_MODEL), jnp.float32)

    # One-time, load-time packing of all weights into a single HBM slab.
    w_slab = jax.block_until_ready(pack_weight_slab(params))

    layer_out, pos_bias = amr_t5_block_forward(hidden_states, w_slab,
                                               params["rel_bias"])
    layer_out = jax.block_until_ready(layer_out)

    ref = reference_forward(hidden_states, params)
    # pl.reciprocal(approx=True) (EUP fast path) perturbs low-order bits of the
    # softmax normalization, so compare at 2e-3 instead of 1e-4.
    np.testing.assert_allclose(np.asarray(layer_out), np.asarray(ref),
                               rtol=2e-3, atol=2e-3)
    print("KERNEL_OK")
</pallas_src>

<mosaic_0001>
module attributes {stable_mosaic.version = 11 : i64} {
  func.func @_amr_t5_block_kernel(%arg0: i32, %arg1: memref<8x32xf32, #tpu.memory_space<vmem>>, %arg2: memref<4x8x8xf32, #tpu.memory_space<vmem>>, %arg3: memref<240x128xf32, #tpu.memory_space<vmem>>, %arg4: memref<8x32xf32, #tpu.memory_space<vmem>>) attributes {dimension_semantics = [#tpu.dimension_semantics<parallel>], iteration_bounds = array<i64: 2>, scalar_prefetch = 0 : i64, scratch_operands = 0 : i64, tpu.core_type = #tpu.core_type<tc>, window_params = [{transform_indices = @transform_0, window_bounds = array<i64: 8, 32>}, {pipeline_mode = #tpu.pipeline_mode<synchronous>, transform_indices = @transform_1, window_bounds = array<i64: 4, 8, 8>}, {pipeline_mode = #tpu.pipeline_mode<synchronous>, transform_indices = @transform_2, window_bounds = array<i64: 240, 128>}, {transform_indices = @transform_3, window_bounds = array<i64: 8, 32>}]} {
    %c0 = arith.constant 0 : index
    %c0_0 = arith.constant 0 : index
    %0 = vector.load %arg1[%c0, %c0_0] : memref<8x32xf32, #tpu.memory_space<vmem>>, vector<8x32xf32>
    %c0_1 = arith.constant 0 : index
    %c0_2 = arith.constant 0 : index
    %1 = vector.load %arg3[%c0_1, %c0_2] : memref<240x128xf32, #tpu.memory_space<vmem>>, vector<32x128xf32>
    %c32 = arith.constant 32 : index
    %c0_3 = arith.constant 0 : index
    %2 = vector.load %arg3[%c32, %c0_3] : memref<240x128xf32, #tpu.memory_space<vmem>>, vector<32x128xf32>
    %c64 = arith.constant 64 : index
    %c0_4 = arith.constant 0 : index
    %3 = vector.load %arg3[%c64, %c0_4] : memref<240x128xf32, #tpu.memory_space<vmem>>, vector<128x32xf32>
    %c192 = arith.constant 192 : index
    %c0_5 = arith.constant 0 : index
    %4 = vector.load %arg3[%c192, %c0_5] : memref<240x128xf32, #tpu.memory_space<vmem>>, vector<32x32xf32>
    %c224 = arith.constant 224 : index
    %c0_6 = arith.constant 0 : index
    %5 = vector.load %arg3[%c224, %c0_6] : memref<240x128xf32, #tpu.memory_space<vmem>>, vector<1x32xf32>
    %c232 = arith.constant 232 : index
    %c0_7 = arith.constant 0 : index
    %6 = vector.load %arg3[%c232, %c0_7] : memref<240x128xf32, #tpu.memory_space<vmem>>, vector<1x32xf32>
    %7 = arith.mulf %0, %0 : vector<8x32xf32>
    %cst = arith.constant dense<0.000000e+00> : vector<8xf32>
    %8 = vector.multi_reduction <add>, %7, %cst [1] : vector<8x32xf32> to vector<8xf32>
    %9 = vector.shape_cast %8 : vector<8xf32> to vector<8x1xf32>
    %cst_8 = arith.constant 3.200000e+01 : f32
    %10 = vector.broadcast %cst_8 : f32 to vector<8x1xf32>
    %11 = arith.divf %9, %10 : vector<8x1xf32>
    %cst_9 = arith.constant 9.99999997E-7 : f32
    %12 = vector.broadcast %cst_9 : f32 to vector<8x1xf32>
    %13 = arith.addf %11, %12 : vector<8x1xf32>
    %14 = math.rsqrt %13 : vector<8x1xf32>
    %15 = vector.broadcast %14 : vector<8x1xf32> to vector<8x32xf32>
    %16 = arith.mulf %0, %15 : vector<8x32xf32>
    %17 = vector.broadcast %5 : vector<1x32xf32> to vector<8x32xf32>
    %18 = arith.mulf %16, %17 : vector<8x32xf32>
    %cst_10 = arith.constant dense<0.000000e+00> : vector<8x128xf32>
    %19 = tpu.matmul %18, %1, %cst_10 {dimension_numbers = #tpu.dot_dimension_numbers<[1], [0], [0], [1], [0, 0, 1, 1], [], []>} : vector<8x32xf32>, vector<32x128xf32>, vector<8x128xf32> -> vector<8x128xf32>
    %20 = vector.extract_strided_slice %19 {offsets = [0, 0], sizes = [8, 8], strides = [1, 1]} : vector<8x128xf32> to vector<8x8xf32>
    %21 = vector.extract_strided_slice %19 {offsets = [0, 32], sizes = [8, 8], strides = [1, 1]} : vector<8x128xf32> to vector<8x8xf32>
    %22 = vector.extract_strided_slice %19 {offsets = [0, 64], sizes = [8, 8], strides = [1, 1]} : vector<8x128xf32> to vector<8x8xf32>
    %cst_11 = arith.constant dense<0.000000e+00> : vector<8x8xf32>
    %23 = tpu.matmul %20, %21, %cst_11 {dimension_numbers = #tpu.dot_dimension_numbers<[1], [1], [0], [0], [0, 0, 1, 0], [], []>} : vector<8x8xf32>, vector<8x8xf32>, vector<8x8xf32> -> vector<8x8xf32>
    %c0_12 = arith.constant 0 : index
    %c0_13 = arith.constant 0 : index
    %c0_14 = arith.constant 0 : index
    %24 = vector.load %arg2[%c0_12, %c0_13, %c0_14] : memref<4x8x8xf32, #tpu.memory_space<vmem>>, vector<1x8x8xf32>
    %25 = vector.shape_cast %24 : vector<1x8x8xf32> to vector<8x8xf32>
    %26 = arith.addf %23, %25 : vector<8x8xf32>
    %cst_15 = arith.constant dense<0xFF800000> : vector<8xf32>
    %27 = vector.multi_reduction <maximumf>, %26, %cst_15 [1] : vector<8x8xf32> to vector<8xf32>
    %28 = vector.shape_cast %27 : vector<8xf32> to vector<8x1xf32>
    %29 = vector.broadcast %28 : vector<8x1xf32> to vector<8x8xf32>
    %30 = arith.subf %26, %29 : vector<8x8xf32>
    %31 = math.exp %30 : vector<8x8xf32>
    %cst_16 = arith.constant dense<0.000000e+00> : vector<8xf32>
    %32 = vector.multi_reduction <add>, %31, %cst_16 [1] : vector<8x8xf32> to vector<8xf32>
    %33 = vector.shape_cast %32 : vector<8xf32> to vector<8x1xf32>
    %34 = tpu.reciprocal %33 {approx = true} : vector<8x1xf32> -> vector<8x1xf32>
    %35 = vector.broadcast %34 : vector<8x1xf32> to vector<8x8xf32>
    %36 = arith.mulf %31, %35 : vector<8x8xf32>
    %cst_17 = arith.constant dense<0.000000e+00> : vector<8x8xf32>
    %37 = tpu.matmul %36, %22, %cst_17 {dimension_numbers = #tpu.dot_dimension_numbers<[1], [0], [0], [1], [0, 0, 1, 1], [], []>} : vector<8x8xf32>, vector<8x8xf32>, vector<8x8xf32> -> vector<8x8xf32>
    %38 = vector.extract_strided_slice %19 {offsets = [0, 8], sizes = [8, 8], strides = [1, 1]} : vector<8x128xf32> to vector<8x8xf32>
    %39 = vector.extract_strided_slice %19 {offsets = [0, 40], sizes = [8, 8], strides = [1, 1]} : vector<8x128xf32> to vector<8x8xf32>
    %40 = vector.extract_strided_slice %19 {offsets = [0, 72], sizes = [8, 8], strides = [1, 1]} : vector<8x128xf32> to vector<8x8xf32>
    %cst_18 = arith.constant dense<0.000000e+00> : vector<8x8xf32>
    %41 = tpu.matmul %38, %39, %cst_18 {dimension_numbers = #tpu.dot_dimension_numbers<[1], [1], [0], [0], [0, 0, 1, 0], [], []>} : vector<8x8xf32>, vector<8x8xf32>, vector<8x8xf32> -> vector<8x8xf32>
    %c1 = arith.constant 1 : index
    %c0_19 = arith.constant 0 : index
    %c0_20 = arith.constant 0 : index
    %42 = vector.load %arg2[%c1, %c0_19, %c0_20] : memref<4x8x8xf32, #tpu.memory_space<vmem>>, vector<1x8x8xf32>
    %43 = vector.shape_cast %42 : vector<1x8x8xf32> to vector<8x8xf32>
    %44 = arith.addf %41, %43 : vector<8x8xf32>
    %cst_21 = arith.constant dense<0xFF800000> : vector<8xf32>
    %45 = vector.multi_reduction <maximumf>, %44, %cst_21 [1] : vector<8x8xf32> to vector<8xf32>
    %46 = vector.shape_cast %45 : vector<8xf32> to vector<8x1xf32>
    %47 = vector.broadcast %46 : vector<8x1xf32> to vector<8x8xf32>
    %48 = arith.subf %44, %47 : vector<8x8xf32>
    %49 = math.exp %48 : vector<8x8xf32>
    %cst_22 = arith.constant dense<0.000000e+00> : vector<8xf32>
    %50 = vector.multi_reduction <add>, %49, %cst_22 [1] : vector<8x8xf32> to vector<8xf32>
    %51 = vector.shape_cast %50 : vector<8xf32> to vector<8x1xf32>
    %52 = tpu.reciprocal %51 {approx = true} : vector<8x1xf32> -> vector<8x1xf32>
    %53 = vector.broadcast %52 : vector<8x1xf32> to vector<8x8xf32>
    %54 = arith.mulf %49, %53 : vector<8x8xf32>
    %cst_23 = arith.constant dense<0.000000e+00> : vector<8x8xf32>
    %55 = tpu.matmul %54, %40, %cst_23 {dimension_numbers = #tpu.dot_dimension_numbers<[1], [0], [0], [1], [0, 0, 1, 1], [], []>} : vector<8x8xf32>, vector<8x8xf32>, vector<8x8xf32> -> vector<8x8xf32>
    %56 = vector.extract_strided_slice %19 {offsets = [0, 16], sizes = [8, 8], strides = [1, 1]} : vector<8x128xf32> to vector<8x8xf32>
    %57 = vector.extract_strided_slice %19 {offsets = [0, 48], sizes = [8, 8], strides = [1, 1]} : vector<8x128xf32> to vector<8x8xf32>
    %58 = vector.extract_strided_slice %19 {offsets = [0, 80], sizes = [8, 8], strides = [1, 1]} : vector<8x128xf32> to vector<8x8xf32>
    %cst_24 = arith.constant dense<0.000000e+00> : vector<8x8xf32>
    %59 = tpu.matmul %56, %57, %cst_24 {dimension_numbers = #tpu.dot_dimension_numbers<[1], [1], [0], [0], [0, 0, 1, 0], [], []>} : vector<8x8xf32>, vector<8x8xf32>, vector<8x8xf32> -> vector<8x8xf32>
    %c2 = arith.constant 2 : index
    %c0_25 = arith.constant 0 : index
    %c0_26 = arith.constant 0 : index
    %60 = vector.load %arg2[%c2, %c0_25, %c0_26] : memref<4x8x8xf32, #tpu.memory_space<vmem>>, vector<1x8x8xf32>
    %61 = vector.shape_cast %60 : vector<1x8x8xf32> to vector<8x8xf32>
    %62 = arith.addf %59, %61 : vector<8x8xf32>
    %cst_27 = arith.constant dense<0xFF800000> : vector<8xf32>
    %63 = vector.multi_reduction <maximumf>, %62, %cst_27 [1] : vector<8x8xf32> to vector<8xf32>
    %64 = vector.shape_cast %63 : vector<8xf32> to vector<8x1xf32>
    %65 = vector.broadcast %64 : vector<8x1xf32> to vector<8x8xf32>
    %66 = arith.subf %62, %65 : vector<8x8xf32>
    %67 = math.exp %66 : vector<8x8xf32>
    %cst_28 = arith.constant dense<0.000000e+00> : vector<8xf32>
    %68 = vector.multi_reduction <add>, %67, %cst_28 [1] : vector<8x8xf32> to vector<8xf32>
    %69 = vector.shape_cast %68 : vector<8xf32> to vector<8x1xf32>
    %70 = tpu.reciprocal %69 {approx = true} : vector<8x1xf32> -> vector<8x1xf32>
    %71 = vector.broadcast %70 : vector<8x1xf32> to vector<8x8xf32>
    %72 = arith.mulf %67, %71 : vector<8x8xf32>
    %cst_29 = arith.constant dense<0.000000e+00> : vector<8x8xf32>
    %73 = tpu.matmul %72, %58, %cst_29 {dimension_numbers = #tpu.dot_dimension_numbers<[1], [0], [0], [1], [0, 0, 1, 1], [], []>} : vector<8x8xf32>, vector<8x8xf32>, vector<8x8xf32> -> vector<8x8xf32>
    %74 = vector.extract_strided_slice %19 {offsets = [0, 24], sizes = [8, 8], strides = [1, 1]} : vector<8x128xf32> to vector<8x8xf32>
    %75 = vector.extract_strided_slice %19 {offsets = [0, 56], sizes = [8, 8], strides = [1, 1]} : vector<8x128xf32> to vector<8x8xf32>
    %76 = vector.extract_strided_slice %19 {offsets = [0, 88], sizes = [8, 8], strides = [1, 1]} : vector<8x128xf32> to vector<8x8xf32>
    %cst_30 = arith.constant dense<0.000000e+00> : vector<8x8xf32>
    %77 = tpu.matmul %74, %75, %cst_30 {dimension_numbers = #tpu.dot_dimension_numbers<[1], [1], [0], [0], [0, 0, 1, 0], [], []>} : vector<8x8xf32>, vector<8x8xf32>, vector<8x8xf32> -> vector<8x8xf32>
    %c3 = arith.constant 3 : index
    %c0_31 = arith.constant 0 : index
    %c0_32 = arith.constant 0 : index
    %78 = vector.load %arg2[%c3, %c0_31, %c0_32] : memref<4x8x8xf32, #tpu.memory_space<vmem>>, vector<1x8x8xf32>
    %79 = vector.shape_cast %78 : vector<1x8x8xf32> to vector<8x8xf32>
    %80 = arith.addf %77, %79 : vector<8x8xf32>
    %cst_33 = arith.constant dense<0xFF800000> : vector<8xf32>
    %81 = vector.multi_reduction <maximumf>, %80, %cst_33 [1] : vector<8x8xf32> to vector<8xf32>
    %82 = vector.shape_cast %81 : vector<8xf32> to vector<8x1xf32>
    %83 = vector.broadcast %82 : vector<8x1xf32> to vector<8x8xf32>
    %84 = arith.subf %80, %83 : vector<8x8xf32>
    %85 = math.exp %84 : vector<8x8xf32>
    %cst_34 = arith.constant dense<0.000000e+00> : vector<8xf32>
    %86 = vector.multi_reduction <add>, %85, %cst_34 [1] : vector<8x8xf32> to vector<8xf32>
    %87 = vector.shape_cast %86 : vector<8xf32> to vector<8x1xf32>
    %88 = tpu.reciprocal %87 {approx = true} : vector<8x1xf32> -> vector<8x1xf32>
    %89 = vector.broadcast %88 : vector<8x1xf32> to vector<8x8xf32>
    %90 = arith.mulf %85, %89 : vector<8x8xf32>
    %cst_35 = arith.constant dense<0.000000e+00> : vector<8x8xf32>
    %91 = tpu.matmul %90, %76, %cst_35 {dimension_numbers = #tpu.dot_dimension_numbers<[1], [0], [0], [1], [0, 0, 1, 1], [], []>} : vector<8x8xf32>, vector<8x8xf32>, vector<8x8xf32> -> vector<8x8xf32>
    %92 = tpu.concatenate %37, %55, %73, %91 in 1 : vector<8x8xf32>, vector<8x8xf32>, vector<8x8xf32>, vector<8x8xf32> -> vector<8x32xf32>
    %cst_36 = arith.constant dense<0.000000e+00> : vector<8x32xf32>
    %93 = tpu.matmul %92, %4, %cst_36 {dimension_numbers = #tpu.dot_dimension_numbers<[1], [0], [0], [1], [0, 0, 1, 1], [], []>} : vector<8x32xf32>, vector<32x32xf32>, vector<8x32xf32> -> vector<8x32xf32>
    %94 = arith.addf %0, %93 : vector<8x32xf32>
    %95 = arith.mulf %94, %94 : vector<8x32xf32>
    %cst_37 = arith.constant dense<0.000000e+00> : vector<8xf32>
    %96 = vector.multi_reduction <add>, %95, %cst_37 [1] : vector<8x32xf32> to vector<8xf32>
    %97 = vector.shape_cast %96 : vector<8xf32> to vector<8x1xf32>
    %cst_38 = arith.constant 3.200000e+01 : f32
    %98 = vector.broadcast %cst_38 : f32 to vector<8x1xf32>
    %99 = arith.divf %97, %98 : vector<8x1xf32>
    %cst_39 = arith.constant 9.99999997E-7 : f32
    %100 = vector.broadcast %cst_39 : f32 to vector<8x1xf32>
    %101 = arith.addf %99, %100 : vector<8x1xf32>
    %102 = math.rsqrt %101 : vector<8x1xf32>
    %103 = vector.broadcast %102 : vector<8x1xf32> to vector<8x32xf32>
    %104 = arith.mulf %94, %103 : vector<8x32xf32>
    %105 = vector.broadcast %6 : vector<1x32xf32> to vector<8x32xf32>
    %106 = arith.mulf %104, %105 : vector<8x32xf32>
    %cst_40 = arith.constant dense<0.000000e+00> : vector<8x128xf32>
    %107 = tpu.matmul %106, %2, %cst_40 {dimension_numbers = #tpu.dot_dimension_numbers<[1], [0], [0], [1], [0, 0, 1, 1], [], []>} : vector<8x32xf32>, vector<32x128xf32>, vector<8x128xf32> -> vector<8x128xf32>
    %cst_41 = arith.constant 0.000000e+00 : f32
    %108 = vector.broadcast %cst_41 : f32 to vector<8x128xf32>
    %109 = arith.maximumf %107, %108 : vector<8x128xf32>
    %cst_42 = arith.constant dense<0.000000e+00> : vector<8x32xf32>
    %110 = tpu.matmul %109, %3, %cst_42 {dimension_numbers = #tpu.dot_dimension_numbers<[1], [0], [0], [1], [0, 0, 1, 1], [], []>} : vector<8x128xf32>, vector<128x32xf32>, vector<8x32xf32> -> vector<8x32xf32>
    %111 = arith.addf %94, %110 : vector<8x32xf32>
    %c0_43 = arith.constant 0 : index
    %c0_44 = arith.constant 0 : index
    %112 = vector.load %arg4[%c0_43, %c0_44] : memref<8x32xf32, #tpu.memory_space<vmem>>, vector<8x32xf32>
    tpu.vector_store %arg4[%c0_43, %c0_44], %111 {strides = array<i32>} : memref<8x32xf32, #tpu.memory_space<vmem>>, vector<8x32xf32>,
    return
  }
  func.func @transform_0(%arg0: i32) -> (i32, i32) {
    %c0_i32 = arith.constant 0 : i32
    %c0_i32_0 = arith.constant 0 : i32
    return %arg0, %c0_i32 : i32, i32
  }
  func.func @transform_1(%arg0: i32) -> (i32, i32, i32) {
    %c0_i32 = arith.constant 0 : i32
    %c0_i32_0 = arith.constant 0 : i32
    %c0_i32_1 = arith.constant 0 : i32
    %c0_i32_2 = arith.constant 0 : i32
    return %c0_i32, %c0_i32_0, %c0_i32_1 : i32, i32, i32
  }
  func.func @transform_2(%arg0: i32) -> (i32, i32) {
    %c0_i32 = arith.constant 0 : i32
    %c0_i32_0 = arith.constant 0 : i32
    %c0_i32_1 = arith.constant 0 : i32
    return %c0_i32, %c0_i32_0 : i32, i32
  }
  func.func @transform_3(%arg0: i32) -> (i32, i32) {
    %c0_i32 = arith.constant 0 : i32
    %c0_i32_0 = arith.constant 0 : i32
    return %arg0, %c0_i32 : i32, i32
  }
}

</mosaic_0001>

<bundles_post_ra>
// kernel: amr_t5_block_forward.1
= control target key start
LH: loop header
LB: loop body
LE: loop exit
PB: predicated region body
PF: predicated region fallthrough
CT: control target
= control target key end

     0   :  { %8 = vsyncpa [#allocation3], 0  ;;  %s1982_s0 = inlined_call_operand.vmem [shape: f32[16,32], index: 0, kind: input, shape index: {}]   ;;  %s1983_s1 = inlined_call_operand.vmem [shape: f32[4,8,8], index: 1, kind: input, shape index: {}]   ;;  %s1984_s2 = inlined_call_operand.vmem [shape: f32[240,128], index: 2, kind: input, shape index: {}]   ;;  %s1985_s3 = inlined_call_operand.hbm [shape: f32[16,32], index: 3, kind: output, shape index: {}]  }
   0x1   :  { %10 = vsyncpa [#allocation3 + $0x1], 0  ;;  %s1681_s12 = smov 0   ;;  %s1683_s13 = smov 0  }
   0x2   :  { %s1685_s14 = smov 0   ;;  %s1687_s15 = smov 0  }
   0x3 LB: > { %s1702_s16 = sadd.s32 4294967295, %s1641_s15   ;;  %s1275_s17 = sadd.s32 4294967294, %s1641_s15   ;;  %s1641_s15 = sphi %s1687_s15, %s1991_s15   ;;  %s1637_s14 = sphi %s1685_s14, %s1990_s14   ;;  %s1633_s13 = sphi %s1683_s13, %s1989_s13   ;;  %s1629_s12 = sphi %s1681_s12, %s1988_s12  }
   0x4   : > { %s1706_s18 = sadd.s32 1, %s1641_s15   ;;  %s91_s19 = sadd.s32 1, %s1637_s14 }
   0x5   : > { %s88_s20 = ssub.s32 %s1641_s15, %s1706_s18  ;;  %p101_p0 = scmp.ne.s32.totalorder %s1637_s14, %s1633_s13 }
   0x6   : > { %p89_p1 = scmp.eq.s32.totalorder %s88_s20, 0  ;;  %p102_p2 = scmp.eq.s32.totalorder %s1702_s16, 1 }
   0x7   : > { %p107_p3 = scmp.ne.s32.totalorder %s1633_s13, %s1629_s12  ;;  %p108_p4 = scmp.eq.s32.totalorder %s1275_s17, 1 }
   0x8   : > { %s1717_s21 = scalar_select %p89_p1, %s1637_s14, %s91_s19  }
   0x9   : > { %p1719_p5 = por %p102_p2, %p101_p0  ;;  %p1723_p6 = por %p108_p4, %p107_p3 }
   0xa   : > { %p1278_p7 = scmp.ge.s32.totalorder %s1641_s15, 1  ;;  %p139_p8 = scmp.lt.s32.totalorder %s1641_s15, 3 }
   0xc   : > { %p140_p9 = pnand %p1278_p7, %p139_p8 }
   0xd   : > { %p162_p10 = scmp.lt.s32.totalorder (!%p140_p9), %s1702_s16, 1  ;;  %vm198_vm0 = vcmask (!%p140_p9), 261120   ;;  %v167_v3 = vld [vmem:[%s1984_s2] sm:$0xff] (!%p140_p9)  ;;  %v168_v4 = vld [vmem:[%s1984_s2 + $0x8] sm:$0xff] (!%p140_p9)  ;;  %v169_v5 = vld [vmem:[%s1984_s2 + $0x10] sm:$0xff] (!%p140_p9)  ;;  %v1643_v6 = vmov (!%p140_p9), 0.0|0.0  }
   0xe   : > { %143 = sbr.rel (%p140_p9) target bundleno = 2253 (0x8cd), region = 32  ;;  %1461 = vmatprep.subr.bf16.mxu1 (!%p140_p9), %v1643_v6  ;;  %v1462_v7 = vpack.c.bf16 (!%p140_p9), %v168_v4, %v167_v3  ;;  %v170_v8 = vld [vmem:[%s1984_s2 + $0x18] sm:$0xff] (!%p140_p9)  ;;  %vm1644_vm1 = vmmov (!%p140_p9), 0   ;;  %v1645_v9 = vmov (!%p140_p9), 0.0   ;;  %v1281_v15 = vld [vmem:[%s1984_s2 + $0xe0] ss:$0 sm:$0xff] (!%p140_p9) }
   0xf   : > { %1361 = vmatprep.mubr.msk.f32.mxu1 (!%p140_p9), %vm1644_vm1, %v1645_v9  ;;  %1374 = vmatprep.subr.mxu0 (!%p140_p9), %v1645_v9  ;;  %v1465_v10 = vpack.c.bf16 (!%p140_p9), %v170_v8, %v169_v5  ;;  %s1646_s17 = smov (!%p140_p9), 88   ;;  %s1647_s19 = smov (!%p140_p9), 96   ;;  %vm289_vm2 = vcmask (!%p140_p9), 64512   ;;  %v285_v27 = vld [vmem:[%s1983_s1] sm:$0xff] (!%p140_p9)  ;;  %v1286_v28 = vld [vmem:[%s1983_s1 + $0x8] sm:$0xff] (!%p140_p9)  ;;  %v1290_v37 = vld [vmem:[%s1983_s1 + $0x10] sm:$0xff] (!%p140_p9) }
  0x10   : > { %1376 = vmatprep.mubr.msk.f32.mxu0 (!%p140_p9), %vm1644_vm1, %v1645_v9  ;;  %1463 = vmatpush3.bf16.msra.mxu1 (!%p140_p9), %v1462_v7  ;;  %s1648_s20 = smov (!%p140_p9), 120   ;;  %s1651_s26 = smov (!%p140_p9), 72   ;;  %v1294_v42 = vld [vmem:[%s1983_s1 + $0x18] sm:$0xff] (!%p140_p9)  ;;  %vm965_vm3 = vcmask (!%p140_p9), 130048   ;;  %vm967_vm4 = vcmask (!%p140_p9), 195584  }
  0x11   : > { %1464 = vmatprep.subr.bf16.mxu1 (!%p140_p9), %v1643_v6  ;;  %s1652_s27 = smov (!%p140_p9), 104   ;;  %s1653_s9 = smov (!%p140_p9), 56  }
  0x12   : > { %s1654_s10 = smov (!%p140_p9), 64   ;;  %s1655_s11 = smov (!%p140_p9), 48  }
  0x13   : > { %s1658_s4 = smov (!%p140_p9), 16   ;;  %s1659_s5 = smov (!%p140_p9), 24  }
  0x14   : > { %1466 = vmatpush3.bf16.msra.mxu1 (!%p140_p9), %v1465_v10  ;;  %s1660_s30 = smov (!%p140_p9), [#allocation2]  }
  0x15   : > { %s163_s24 = scalar_select %p162_p10, %s1702_s16, 1  ;;  %1364 = vmatprep.subr.mxu1 %v1645_v9 }
  0x17   : > { %s1280_s25 = sshll.u32 %s163_s24, 3  ;;  %s1649_s24 = smov 80  }
  0x18   : > { %s165_s28 = scalar_lea.vmem %s1982_s0, %s1280_s25  ;;  %s1650_s25 = smov 112  }
  0x19   : > { %v1734_v0 = vld [vmem:[%s165_s28] sm:$0xff] }
  0x1a   : > { %v197_v1 = vmul.f32 %v1734_v0, %v1734_v0 }
  0x1c   : > { %v199_v2 = vsel %vm198_vm0, %v197_v1, 0.0 }
  0x1d   : > { %200 = vadd.xlane.f32.xlu0 %v199_v2 }
  0xaa   : > { %v201_v11 = vpop.xlane.xlu0 %200 }
  0xab   : > { %v203_v12 = vmul.f32 0.03125, %v201_v11 }
  0xad   : > { %v204_v13 = vadd.f32 1e-06, %v203_v12 }
  0xaf   : > { %1559 = vrsqrt.f32 %v204_v13 }
  0xb9   : > { %v1560_v14 = vpop.eup %1559 }
  0xba   : > { %v206_v16 = vmul.f32 %v1560_v14, %v1734_v0 }
  0xbc   : > { %v211_v17 = vmul.f32 %v1281_v15, %v206_v16 }
  0xbe   : > { %1362 = vmatmul.mubr.msk.f32.vlgmr.msra.gmra.mrb[0].mxu1 %vm198_vm0, %v211_v17 }
  0xbf   : > { %1366 = vmatprep.mubr.msk.f32.mxu1 %vm1644_vm1, %v1645_v9 }
 0x191   : > { %v1766_v18 = vpop.f32.mrb[0].mxu1 }
 0x192   : > { %455 = vrot.lane.b32.xlu1 %v1766_v18, %s1646_s17  ;;  %287 = vrot.lane.b32.xlu0 %v1766_v18, %s1647_s19  ;;  %v1363_v19 = vpop.f32.mrb[1].mxu1  ;;  %s1656_s17 = smov 40  }
 0x196   : > { %453 = vrot.lane.b32.xlu1 %v1766_v18, %s1648_s20  ;;  %s1302_s20 = sshll.u32 %s1702_s16, 7 }
 0x197   : > { %s1939_s28 = scalar_lea.hbm %s1985_s3, %s1302_s20 }
 0x19a   : > { %622 = vrot.lane.b32.xlu1 %v1766_v18, %s1649_s24 }
 0x19e   : > { %620 = vrot.lane.b32.xlu1 %v1766_v18, %s1650_s25 }
 0x1a2   : > { %789 = vrot.lane.b32.xlu1 %v1766_v18, %s1651_s26  ;;  %s1657_s26 = smov 8  }
 0x1a6   : > { %787 = vrot.lane.b32.xlu1 %v1766_v18, %s1652_s27 }
 0x204   : > { %v456_v20 = vpop.permute.xlu1 %455  ;;  %v288_v21 = vpop.permute.xlu0 %287 }
 0x205   : > { %1365 = vmatpush3.xpose.msk.msra.mxu1 %vm289_vm2, %v288_v21  ;;  %1375 = vmatpush3.xpose.msk.msra.mxu0 %vm289_vm2, %v456_v20 }
 0x206   : > { %1384 = vmatprep.subr.mxu0 %v1645_v9  ;;  %1369 = vmatprep.subr.mxu1 %v1645_v9 }
 0x208   : > { %v454_v22 = vpop.permute.xlu1 %453  ;;  %1367 = vmatmul.mubr.msk.f32.vlgmr.msra.gmra.mrb[2].mxu1 %vm289_vm2, %v1766_v18 }
 0x209   : > { %1377 = vmatmul.mubr.msk.f32.vlgmr.msra.gmra.mrb[0].mxu0 %vm289_vm2, %v454_v22  ;;  %1371 = vmatprep.mubr.msk.f32.mxu1 %vm1644_vm1, %v1645_v9  ;;  %v191_v22 = vld [vmem:[%s1984_s2 + $0xc0] sm:$0xff] }
 0x20a   : > { %1386 = vmatprep.mubr.msk.f32.mxu0 %vm1644_vm1, %v1645_v9 }
 0x20c   : > { %v623_v23 = vpop.permute.xlu1 %622 }
 0x20d   : > { %1385 = vmatpush3.xpose.msk.msra.mxu0 %vm289_vm2, %v623_v23  ;;  %v192_v23 = vld [vmem:[%s1984_s2 + $0xc8] sm:$0xff] }
 0x20e   : > { %1394 = vmatprep.subr.mxu0 %v1645_v9 }
 0x210   : > { %v621_v24 = vpop.permute.xlu1 %620 }
 0x211   : > { %1387 = vmatmul.mubr.msk.f32.vlgmr.msra.gmra.mrb[2].mxu0 %vm289_vm2, %v621_v24  ;;  %v1468_v24 = vpack.c.bf16 %v192_v23, %v191_v22 }
 0x212   : > { %1396 = vmatprep.mubr.msk.f32.mxu0 %vm1644_vm1, %v1645_v9 }
 0x214   : > { %v790_v25 = vpop.permute.xlu1 %789 }
 0x215   : > { %1395 = vmatpush3.xpose.msk.msra.mxu0 %vm289_vm2, %v790_v25 }
 0x216   : > { %1479 = vmatprep.subr.bf16.mxu0 %v1643_v6 }
 0x218   : > { %v788_v26 = vpop.permute.xlu1 %787 }
 0x219   : > { %1397 = vmatmul.mubr.msk.f32.vlgmr.msra.gmra.mrb[4].mxu0 %vm289_vm2, %v788_v26 }
 0x21a   : > { %1458 = vmatprep.mubr.msk.f32.mxu0 %vm1644_vm1, %v1645_v9 }
 0x2db   : > { %v360_v29 = vpop.f32.mrb[2].mxu1 }
 0x2dc   : > { %v361_v30 = vadd.f32 %v360_v29, %v285_v27  ;;  %v1368_v31 = vpop.f32.mrb[3].mxu1  ;;  %v527_v32 = vpop.f32.mrb[0].mxu0  ;;  %v193_v29 = vld [vmem:[%s1984_s2 + $0xd0] sm:$0xff] }
 0x2dd   : > { %v528_v33 = vadd.f32 %v1286_v28, %v527_v32  ;;  %v1378_v34 = vpop.f32.mrb[1].mxu0 }
 0x2de   : > { %v364_v35 = vsel %vm289_vm2, %v361_v30, -inf }
 0x2df   : > { %365 = vmax.xlane.f32.xlu1 %v364_v35  ;;  %v531_v36 = vsel %vm289_vm2, %v528_v33, -inf }
 0x2e0   : > { %532 = vmax.xlane.f32.xlu0 %v531_v36 }
 0x2e4   : > { %v694_v38 = vpop.f32.mrb[2].mxu0 }
 0x2e5   : > { %v695_v39 = vadd.f32 %v1290_v37, %v694_v38  ;;  %v1388_v40 = vpop.f32.mrb[3].mxu0 }
 0x2e7   : > { %v698_v41 = vsel %vm289_vm2, %v695_v39, -inf }
 0x2e8   : > { %699 = vmax.xlane.f32.xlu0 %v698_v41 }
 0x2ec   : > { %v861_v43 = vpop.f32.mrb[4].mxu0 }
 0x2ed   : > { %v862_v44 = vadd.f32 %v1294_v42, %v861_v43  ;;  %v1398_v45 = vpop.f32.mrb[5].mxu0 }
 0x2ef   : > { %v865_v46 = vsel %vm289_vm2, %v862_v44, -inf }
 0x2f0   : > { %866 = vmax.xlane.f32.xlu1 %v865_v46 }
 0x301   : > { %542 = vrot.lane.b32.xlu1 %v1766_v18, %s1653_s9 }
 0x36c   : > { %v366_v47 = vpop.xlane.xlu1 %365 }
 0x36d   : > { %v367_v48 = vsub.f32 %v361_v30, %v366_v47  ;;  %v533_v49 = vpop.xlane.xlu0 %532  ;;  %v194_v30 = vld [vmem:[%s1984_s2 + $0xd8] sm:$0xff]  ;;  %v171_v47 = vld [vmem:[%s1984_s2 + $0x20] sm:$0xff] }
 0x36e   : > { %v534_v50 = vsub.f32 %v528_v33, %v533_v49  ;;  %v1471_v31 = vpack.c.bf16 %v194_v30, %v193_v29  ;;  %v174_v49 = vld [vmem:[%s1984_s2 + $0x38] sm:$0xff] }
 0x36f   : > { %v368_v51 = vmul.f32 1.442695, %v367_v48  ;;  %v172_v48 = vld [vmem:[%s1984_s2 + $0x28] sm:$0xff] }
 0x370   : > { %v535_v52 = vmul.f32 1.442695, %v534_v50 }
 0x371   : > { %1561 = vpow2.f32 %v368_v51  ;;  %v175_v51 = vld [vmem:[%s1984_s2 + $0x40] sm:$0xff] }
 0x372   : > { %1563 = vpow2.f32 %v535_v52  ;;  %v176_v52 = vld [vmem:[%s1984_s2 + $0x48] sm:$0xff] }
 0x375   : > { %v700_v62 = vpop.xlane.xlu0 %699 }
 0x376   : > { %v701_v63 = vsub.f32 %v695_v39, %v700_v62 }
 0x378   : > { %v702_v1 = vmul.f32 1.442695, %v701_v63  ;;  %v183_v63 = vld [vmem:[%s1984_s2 + $0x80] sm:$0xff] }
 0x37b   : > { %v1562_v53 = vpop.eup %1561 }
 0x37c   : > { %v1564_v54 = vpop.eup %1563  ;;  %v370_v55 = vsel %vm289_vm2, %v1562_v53, 0.0 }
 0x37d   : > { %371 = vadd.xlane.f32.xlu0 %v370_v55  ;;  %v867_v56 = vpop.xlane.xlu1 %866  ;;  %v537_v57 = vsel %vm289_vm2, %v1564_v54, 0.0  ;;  %v178_v55 = vld [vmem:[%s1984_s2 + $0x58] sm:$0xff] }
 0x37e   : > { %v868_v58 = vsub.f32 %v862_v44, %v867_v56  ;;  %538 = vadd.xlane.f32.xlu1 %v537_v57  ;;  %v179_v57 = vld [vmem:[%s1984_s2 + $0x60] sm:$0xff] }
 0x380   : > { %v869_v59 = vmul.f32 1.442695, %v868_v58  ;;  %v180_v58 = vld [vmem:[%s1984_s2 + $0x68] sm:$0xff] }
 0x381   : > { %v543_v4 = vpop.permute.xlu1 %542 }
 0x382   : > { %1565 = vpow2.f32 %v869_v59  ;;  %v1486_v59 = vpack.c.bf16 %v180_v58, %v179_v57 }
 0x383   : > { %1567 = vpow2.f32 %v702_v1  ;;  %v184_v1 = vld [vmem:[%s1984_s2 + $0x88] sm:$0xff] }
 0x38c   : > { %v1566_v60 = vpop.eup %1565 }
 0x38d   : > { %v871_v61 = vsel %vm289_vm2, %v1566_v60, 0.0  ;;  %v1568_v2 = vpop.eup %1567 }
 0x38e   : > { %872 = vadd.xlane.f32.xlu1 %v871_v61  ;;  %v704_v3 = vsel %vm289_vm2, %v1568_v2, 0.0  ;;  %v182_v61 = vld [vmem:[%s1984_s2 + $0x78] sm:$0xff] }
 0x393   : > { %375 = vrot.lane.b32.xlu0 %v1766_v18, %s1654_s10 }
 0x39f   : > { %709 = vrot.lane.b32.xlu1 %v1766_v18, %s1655_s11 }
 0x3b2   : > { %705 = vadd.xlane.f32.xlu0 %v704_v3  ;;  %v185_v3 = vld [vmem:[%s1984_s2 + $0x90] sm:$0xff] }
 0x3c8   : > { %876 = vrot.lane.b32.xlu0 %v1766_v18, %s1656_s17  ;;  %s159_s17 = sand.u32 1, %s1633_s13  }
 0x3c9   : > { %s1279_s19 = sshll.u32 %s159_s17, 3  ;;  %s1203_s29 = scalar_lea.sflag [#allocation3], %s159_s17 }
 0x3ca   : > { %s161_s24 = scalar_lea.vmem [#allocation2], %s1279_s19 }
 0x3cb   : > { %s1216_s25 = sshll.u32 %s161_s24, 4  ;;  %s1941_s25 = int_to_ptr.vmem [resolvable:$true] %s1216_s25 }
 0x3cc   : > { %s1579_s16 = scalar_lea.vmem %s1941_s25, 128 }
 0x3cd   : > { %p1580_p11 = scmp.ne.s32.totalorder %s1941_s25, %s1579_s16 }
 0x3cf   : > { %p1581_p12 = pnand %p1580_p11, %p1719_p5 }
 0x3d1   : > { %p1582_p13 = pneg %p1581_p12 }
 0x40a   : > { %v372_v5 = vpop.xlane.xlu0 %371 }
 0x40b   : > { %1569 = vrcp.f32 %v372_v5  ;;  %v539_v7 = vpop.xlane.xlu1 %538 }
 0x40c   : > { %1571 = vrcp.f32 %v539_v7  ;;  %v187_v7 = vld [vmem:[%s1984_s2 + $0xa0] sm:$0xff] }
 0x40e   : > { %v376_v8 = vpop.permute.xlu0 %375 }
 0x40f   : > { %1370 = vmatpush3.msra.mxu1 %v376_v8  ;;  %v188_v8 = vld [vmem:[%s1984_s2 + $0xa8] sm:$0xff] }
 0x410   : > { %1379 = vmatprep.subr.mxu1 %v1645_v9 }
 0x415   : > { %v1570_v10 = vpop.eup %1569 }
 0x416   : > { %v374_v11 = vmul.f32 %v1570_v10, %v1562_v53  ;;  %v1572_v12 = vpop.eup %1571  ;;  %v177_v53 = vld [vmem:[%s1984_s2 + $0x50] sm:$0xff]  ;;  %v1498_v10 = vpack.c.bf16 %v188_v8, %v187_v7 }
 0x417   : > { %v541_v13 = vmul.f32 %v1572_v12, %v1564_v54  ;;  %v1480_v54 = vpack.c.bf16 %v176_v52, %v175_v51  ;;  %v1483_v56 = vpack.c.bf16 %v178_v55, %v177_v53 }
 0x418   : > { %1372 = vmatmul.mubr.msk.f32.vlgmr.msra.gmra.mrb[4].mxu1 %vm289_vm2, %v374_v11 }
 0x419   : > { %1380 = vmatpush3.msra.mxu1 %v543_v4  ;;  %1381 = vmatprep.mubr.msk.f32.mxu1 %vm1644_vm1, %v1645_v9  ;;  %v186_v4 = vld [vmem:[%s1984_s2 + $0x98] sm:$0xff] }
 0x41a   : > { %1389 = vmatprep.subr.mxu1 %v1645_v9  ;;  %1481 = vmatpush3.bf16.msra.mxu0 %v1480_v54  ;;  %v1495_v5 = vpack.c.bf16 %v186_v4, %v185_v3 }
 0x41b   : > { %v873_v14 = vpop.xlane.xlu1 %872  ;;  %1482 = vmatprep.subr.bf16.mxu0 %v1643_v6 }
 0x41c   : > { %1382 = vmatmul.mubr.msk.f32.vlgmr.msra.gmra.mrb[6].mxu1 %vm289_vm2, %v541_v13 }
 0x41d   : > { %1391 = vmatprep.mubr.msk.f32.mxu1 %vm1644_vm1, %v1645_v9 }
 0x41e   : > { %1484 = vmatpush3.bf16.msra.mxu0 %v1483_v56 }
 0x41f   : > { %v710_v15 = vpop.permute.xlu1 %709  ;;  %1485 = vmatprep.subr.bf16.mxu0 %v1643_v6 }
 0x420   : > { %1390 = vmatpush3.msra.mxu1 %v710_v15  ;;  %v1299_v15 = vld [vmem:[%s1984_s2 + $0xe8] ss:$0 sm:$0xff] }
 0x421   : > { %1399 = vmatprep.subr.mxu1 %v1645_v9 }
 0x422   : > { %1487 = vmatpush3.bf16.msra.mxu0 %v1486_v59 }
 0x423   : > { %1488 = vmatprep.subr.bf16.mxu0 %v1643_v6 }
 0x43f   : > { %v706_v16 = vpop.xlane.xlu0 %705 }
 0x440   : > { %1573 = vrcp.f32 %v706_v16 }
 0x441   : > { %1575 = vrcp.f32 %v873_v14 }
 0x443   : > { %v877_v20 = vpop.permute.xlu0 %876 }
 0x44a   : > { %v1574_v17 = vpop.eup %1573 }
 0x44b   : > { %v708_v18 = vmul.f32 %v1574_v17, %v1568_v2  ;;  %v1576_v19 = vpop.eup %1575  ;;  %v1492_v2 = vpack.c.bf16 %v184_v1, %v183_v63 }
 0x44c   : > { %v875_v21 = vmul.f32 %v1576_v19, %v1566_v60  ;;  %v181_v60 = vld [vmem:[%s1984_s2 + $0x70] sm:$0xff] }
 0x44d   : > { %1392 = vmatmul.mubr.msk.f32.vlgmr.msra.gmra.mrb[8].mxu1 %vm289_vm2, %v708_v18  ;;  %v1489_v62 = vpack.c.bf16 %v182_v61, %v181_v60  ;;  %v190_v18 = vld [vmem:[%s1984_s2 + $0xb8] sm:$0xff] }
 0x44e   : > { %1400 = vmatpush3.msra.mxu1 %v877_v20  ;;  %1401 = vmatprep.mubr.msk.f32.mxu1 %vm1644_vm1, %v1645_v9 }
 0x44f   : > { %1467 = vmatprep.subr.bf16.mxu1 %v1643_v6  ;;  %1490 = vmatpush3.bf16.msra.mxu0 %v1489_v62 }
 0x450   : > { %1491 = vmatprep.subr.bf16.mxu0 %v1643_v6 }
 0x451   : > { %1402 = vmatmul.mubr.msk.f32.vlgmr.msra.gmra.mrb[10].mxu1 %vm289_vm2, %v875_v21 }
 0x452   : > { %1412 = vmatprep.mubr.msk.f32.mxu1 %vm1644_vm1, %v1645_v9  ;;  %1469 = vmatpush3.bf16.msra.mxu1 %v1468_v24 }
 0x453   : > { %1470 = vmatprep.subr.bf16.mxu1 %v1643_v6  ;;  %1493 = vmatpush3.bf16.msra.mxu0 %v1492_v2 }
 0x454   : > { %1494 = vmatprep.subr.bf16.mxu0 %v1643_v6 }
 0x456   : > { %1472 = vmatpush3.bf16.msra.mxu1 %v1471_v31 }
 0x457   : > { %1473 = vmatprep.subr.bf16.mxu1 %v1643_v6  ;;  %1496 = vmatpush3.bf16.msra.mxu0 %v1495_v5 }
 0x458   : > { %1497 = vmatprep.subr.bf16.mxu0 %v1643_v6 }
 0x45b   : > { %1499 = vmatpush3.bf16.msra.mxu0 %v1498_v10 }
 0x45c   : > { %1500 = vmatprep.subr.bf16.mxu0 %v1643_v6 }
 0x4eb   : > { %v447_v25 = vpop.f32.mrb[4].mxu1 }
 0x4ec   : > { %v1373_v26 = vpop.f32.mrb[5].mxu1 }
 0x4ef   : > { %v614_v27 = vpop.f32.mrb[6].mxu1 }
 0x4f0   : > { %953 = vrot.lane.b32.xlu1 %v614_v27, %s1657_s26  ;;  %v1383_v28 = vpop.f32.mrb[7].mxu1 }
 0x520   : > { %v781_v32 = vpop.f32.mrb[8].mxu1 }
 0x521   : > { %957 = vrot.lane.b32.xlu0 %v781_v32, %s1658_s4  ;;  %v1393_v33 = vpop.f32.mrb[9].mxu1  ;;  %s1583_s4 = sshll.u32 %s1660_s30, 4  ;;  %s1584_s4 = int_to_ptr.vmem [resolvable:$false] %s1583_s4 }
 0x522   : > { %p1586_p0 = scmp.lt.s32.totalorder %s1941_s25, %s1584_s4 }
 0x524   : > { %v948_v34 = vpop.f32.mrb[10].mxu1 }
 0x525   : > { %961 = vrot.lane.b32.xlu1 %v948_v34, %s1659_s5  ;;  %v1403_v35 = vpop.f32.mrb[11].mxu1  ;;  %s1585_s5 = scalar_lea.vmem %s1584_s4, 256 }
 0x526   : > { %p1587_p1 = scmp.lt.s32.totalorder %s1585_s5, %s1579_s16 }
 0x528   : > { %p1588_p2 = por %p1587_p1, %p1586_p0 }
 0x52a   : > { %p1589_p3 = pnand %p1588_p2, %p1582_p13 }
 0x562   : > { %v954_v36 = vpop.permute.xlu1 %953 }
 0x563   : > { %v964_v38 = vsel %vm289_vm2, %v447_v25, %v954_v36 }
 0x593   : > { %v958_v37 = vpop.permute.xlu0 %957 }
 0x594   : > { %v966_v39 = vsel %vm965_vm3, %v964_v38, %v958_v37 }
 0x597   : > { %v962_v40 = vpop.permute.xlu1 %961 }
 0x598   : > { %v968_v41 = vsel %vm967_vm4, %v966_v39, %v962_v40 }
 0x599   : > { %1413 = vmatmul.mubr.msk.f32.vlgmr.msra.gmra.mrb[12].mxu1 %vm198_vm0, %v968_v41 }
 0x59a   : > { %1423 = vmatprep.mubr.msk.f32.mxu1 %vm1644_vm1, %v1645_v9  ;;  %v1474_v9 = vpack.c.bf16 %v172_v48, %v171_v47 }
 0x59c   : > { %1475 = vmatpush3.bf16.msra.mxu1 %v1474_v9 }
 0x59d   : > { %1476 = vmatprep.subr.bf16.mxu1 %v1643_v6  ;;  %v189_v6 = vld [vmem:[%s1984_s2 + $0xb0] sm:$0xff] }
 0x59e   : > { %v1501_v19 = vpack.c.bf16 %v190_v18, %v189_v6 }
 0x5a0   : > { %1502 = vmatpush3.bf16.msra.mxu0 %v1501_v19 }
 0x66c   : > { %v1038_v42 = vpop.f32.mrb[12].mxu1 }
 0x66d   : > { %v1855_v43 = vadd.f32 %v1038_v42, %v1734_v0  ;;  %v1414_v44 = vpop.f32.mrb[13].mxu1  ;;  %v173_v0 = vld [vmem:[%s1984_s2 + $0x30] sm:$0xff] }
 0x66e   : > { %v1477_v50 = vpack.c.bf16 %v174_v49, %v173_v0 }
 0x66f   : > { %v1043_v45 = vmul.f32 %v1855_v43, %v1855_v43 }
 0x670   : > { %1478 = vmatpush3.bf16.msra.mxu1 %v1477_v50 }
 0x671   : > { %v1044_v46 = vsel %vm198_vm0, %v1043_v45, 0.0 }
 0x672   : > { %1045 = vadd.xlane.f32.xlu0 %v1044_v46 }
 0x6ff   : > { %v1046_v11 = vpop.xlane.xlu0 %1045 }
 0x700   : > { %v1047_v12 = vmul.f32 0.03125, %v1046_v11 }
 0x702   : > { %v1048_v13 = vadd.f32 1e-06, %v1047_v12 }
 0x704   : > { %1577 = vrsqrt.f32 %v1048_v13 }
 0x70e   : > { %v1578_v14 = vpop.eup %1577 }
 0x70f   : > { %v1050_v16 = vmul.f32 %v1578_v14, %v1855_v43 }
 0x711   : > { %v1055_v17 = vmul.f32 %v1299_v15, %v1050_v16 }
 0x713   : > { %1424 = vmatmul.mubr.msk.f32.vlgmr.msra.gmra.mrb[14].mxu1 %vm198_vm0, %v1055_v17 }
 0x7e6   : > { %v1125_v20 = vpop.f32.mrb[14].mxu1 }
 0x7e7   : > { %v1129_v21 = vmax.f32 %v1125_v20, 0.0  ;;  %v1425_v22 = vpop.f32.mrb[15].mxu1 }
 0x7e9   : > { %1459 = vmatmul.mubr.f32.vlgmr.msra.gmra.mrb[6].mxu0 %v1129_v21 }
 0x8bc   : > { %v1196_v23 = vpop.f32.mrb[6].mxu0 }
 0x8bd   : > { %v1200_v24 = vadd.f32 %v1196_v23, %v1855_v43  ;;  %v1460_v25 = vpop.f32.mrb[7].mxu0 }
 0x8bf   : > { %1201 = vst.msk [vmem:[%s161_s24] sm:$0xff] %vm198_vm0, %v1200_v24 }
 0x8c0   : > { %1592 = shalt.err (!%p1589_p3)
}
 0x8c1   : > { %s1593_s6 = scalar_lea.hbm %s1939_s28, 128  ;;  %s1597_s9 = scalar_lea.hbm %s1985_s3, 256 }
 0x8c2   : > { %p1594_p4 = scmp.ne.s32.totalorder %s1939_s28, %s1593_s6  ;;  %p1598_p9 = scmp.lt.u32.totalorder %s1939_s28, %s1985_s3 }
 0x8c3   : > { %p1599_p10 = scmp.lt.u32.totalorder %s1597_s9, %s1593_s6  ;;  %p1601_p12 = scmp.lt.u32.totalorder %s1593_s6, %s1939_s28 }
 0x8c4   : > { %p1595_p7 = pnand %p1594_p4, %p1719_p5 }
 0x8c5   : > { %p1600_p11 = por %p1599_p10, %p1598_p9 }
 0x8c6   : > { %p1596_p8 = pneg %p1595_p7 }
 0x8c7   : > { %p1602_p13 = por %p1601_p12, %p1600_p11 }
 0x8c9   : > { %p1603_p0 = pnand %p1602_p13, %p1596_p8 }
 0x8cb   : > { %1606 = shalt.err (!%p1603_p0)
}
 0x8cc   : > { %1503 = dma.vmem_to_hbm [thread:$0]  (%p1719_p5), %s1941_s25, 128, %s1939_s28, %s1203_s29  }
 0x8cd PF: > { %p1509_p1 = scmp.ge.s32.totalorder %s1641_s15, 2  ;;  %s1228_s17 = sand.u32 1, %s1629_s12  }
 0x8ce   : > { %s1229_s19 = scalar_lea.sflag [#allocation3], %s1228_s17 }
 0x8cf   : > { %p1506_p2 = pnand %p1509_p1, %p1723_p6 }
 0x8d1   : > { %1624 = dma.done.wait (!%p1506_p2), %s1229_s19, 128  }
 0x8d2   : > { %1626 = vsyncadd (!%p1506_p2), %s1229_s19, 4294967168  ;;  %p13_p3 = scmp.ge.s32.totalorder %s1706_s18, 4   ;;  %s1988_s12 = smov %s1633_s13 }
 0x8d3   : > { %s1989_s13 = smov %s1637_s14  ;;  %s1990_s14 = smov %s1717_s21 }
 0x8d4   : > { %s1991_s15 = smov %s1706_s18  ;;  %15 = sbr.rel (!%p13_p3) target bundleno = 3 (0x3), region = 70 }
 0x8db   :  { %1234 = vsyncpa [#allocation3], 1 }
 0x8dc   :  { %1236 = vsyncpa [#allocation3 + $0x1], 1 }

</bundles_post_ra>
